<compile_context>
chip_gen: v7x
topology: tpu7x:2x2x1
jax: 0.10.0
libtpu: 0.0.40
codegen_flags: <defaults>
</compile_context>

<pallas_src>
import functools
import math

import jax
import jax.numpy as jnp
from jax import lax
from jax.experimental import pallas as pl
from jax.experimental.pallas import tpu as pltpu


# ---------------------------------------------------------------------------
# Kernel
# ---------------------------------------------------------------------------
def _mhsa_kernel(xq_ref, xkv_ref, wq_ref, bq_ref, wkv_ref, bv_ref, wo_ref, bo_ref,
                 o_ref, acc_ref, *, heads_per_group, head_dim, precise):
    hg = pl.program_id(2)

    @pl.when(hg == 0)
    def _init():
        acc_ref[...] = jnp.zeros_like(acc_ref)

    cdt = xq_ref.dtype                     # MXU operand dtype: bf16 (fast) or f32 (precise)
    G, D = heads_per_group, head_dim
    GD = G * D

    xq = xq_ref[0]                         # (TQ, E)  query rows of this q-tile
    xkv = xkv_ref[0]                       # (S,  E)  full sequence for K/V

    # Q projection for this head group; 1/sqrt(D) is already folded into wq/bq.
    q_blk = lax.dot_general(xq, wq_ref[0], (((1,), (0,)), ((), ())),
                            preferred_element_type=jnp.float32) + bq_ref[0]     # (TQ, GD)

    # Fused K/V projection (single MXU pass, N = 2*G*D). Key bias dropped: softmax is
    # exactly invariant to the per-row constant it would add to the scores.
    kv_blk = lax.dot_general(xkv, wkv_ref[0], (((1,), (0,)), ((), ())),
                             preferred_element_type=jnp.float32)                # (S, 2GD)
    k_blk = kv_blk[:, :GD]                                                      # (S, GD)
    v_blk = kv_blk[:, GD:] + bv_ref[0]                                          # (S, GD)

    # Per-head attention within the group (static unroll; G is small).
    ctx_parts = []
    for g in range(G):
        sl = slice(g * D, (g + 1) * D)
        qg = q_blk[:, sl].astype(cdt)
        kg = k_blk[:, sl].astype(cdt)
        vg = v_blk[:, sl].astype(cdt)

        # scores = qg @ kg^T without an explicit transpose: contract last dims of both.
        s = lax.dot_general(qg, kg, (((1,), (1,)), ((), ())),
                            preferred_element_type=jnp.float32)                 # (TQ, S)

        # Numerically stable softmax; statistics stay f32.
        s = s - jnp.max(s, axis=-1, keepdims=True)
        p = jnp.exp(s)
        denom = jnp.sum(p, axis=-1, keepdims=True)
        if precise:
            p = p / denom
        else:
            p = p * pl.reciprocal(denom, approx=True)
        # (dropout on p is identity — eval mode)

        ctx_parts.append(jnp.dot(p.astype(cdt), vg,
                                 preferred_element_type=jnp.float32))           # (TQ, D)

    ctx = ctx_parts[0] if G == 1 else jnp.concatenate(ctx_parts, axis=-1)       # (TQ, GD)

    # Accumulate this head group's contribution through its Wo slice; the concatenated
    # (S, E) context is never materialized.
    acc_ref[...] += jnp.dot(ctx.astype(cdt), wo_ref[0],
                            preferred_element_type=jnp.float32)                 # (TQ, E)

    @pl.when(hg == pl.num_programs(2) - 1)
    def _finalize():
        o_ref[0] = (acc_ref[...] + bo_ref[...]).astype(o_ref.dtype)


# ---------------------------------------------------------------------------
# Wrapper helpers
# ---------------------------------------------------------------------------
def _pick_group_size(num_heads, head_dim, lane_target=256):
    """Largest G dividing num_heads with G*head_dim <= lane_target (MXU lane width)."""
    best = 1
    for g in range(1, num_heads + 1):
        if num_heads % g == 0 and g * head_dim <= lane_target:
            best = g
    return best


def _pick_q_tile(seq_len, target=256):
    """Largest multiple-of-8 divisor of seq_len that is <= target (else full seq)."""
    if seq_len <= target:
        return seq_len
    for t in range(target, 7, -8):
        if seq_len % t == 0:
            return t
    return seq_len


def _vmem_limit_bytes(S, E, tq, GD, compute_bytes, out_bytes):
    """Explicit scoped-VMEM budget: double-buffered blocks + f32 accumulator + headroom,
    capped at 3/4 of the chip's physical VMEM (~48 MiB on v7x)."""
    block_bytes = (
        tq * E * compute_bytes          # x q-tile
        + S * E * compute_bytes         # x full sequence (K/V source)
        + E * GD * compute_bytes        # Wq group slice
        + GD * 4                        # bq (f32)
        + E * 2 * GD * compute_bytes    # fused Wkv group slice
        + GD * 4                        # bv (f32)
        + GD * E * compute_bytes        # Wo group slice
        + E * 4                         # bo (f32)
        + tq * E * out_bytes            # output q-tile
    )
    est = 2 * block_bytes + tq * E * 4  # double-buffered pipeline + f32 accumulator
    try:
        cap = pltpu.get_tpu_info().vmem_capacity_bytes
    except Exception:
        cap = 64 * 1024 * 1024          # conservative (v7x per-TC) fallback
    return int(min(cap * 3 // 4, max(32 * 1024 * 1024, 2 * est)))


def prepare_mhsa_params(params, *, num_heads, group_size=None, precise=False):
    """One-time head-group-major repack + cast of the (in, out) projection weights.

    Hoisted out of the per-call path: call once at parameter-load time and reuse the
    result across forward calls (under jit these become compile-time constants).
    """
    E = params["wq"].shape[0]
    H = num_heads
    assert E % H == 0, "embed_dim must be divisible by num_heads"
    D = E // H
    G = group_size if group_size is not None else _pick_group_size(H, D)
    assert H % G == 0, "group_size must divide num_heads"
    HG = H // G
    GD = G * D
    cdt = jnp.float32 if precise else jnp.bfloat16
    scale = 1.0 / math.sqrt(D)

    def pack_w(w):   # (E, E) (in, out) -> (H/G, E, G*D), head-group major
        return w.reshape(E, HG, GD).transpose(1, 0, 2)

    def pack_b(b):   # (1, E) -> (H/G, 1, G*D)
        return b.reshape(1, HG, GD).transpose(1, 0, 2)

    wq = (pack_w(params["wq"]) * scale).astype(cdt)
    bq = pack_b(params["bq"]) * scale                                   # f32
    wkv = jnp.concatenate([pack_w(params["wk"]), pack_w(params["wv"])],
                          axis=-1).astype(cdt)                          # (H/G, E, 2*G*D)
    bv = pack_b(params["bv"])                                           # f32
    # Key bias (bk) intentionally dropped: per-query-row constant, softmax-invariant.
    wo = params["wo"].reshape(HG, GD, E).astype(cdt)                    # (H/G, G*D, E)
    bo = params["bo"]                                                   # (1, E) f32
    return {"wq": wq, "bq": bq, "wkv": wkv, "bv": bv, "wo": wo, "bo": bo}


def mhsa_forward(x, packed, *, num_heads, precise=False, q_tile_target=256):
    """x: (B, S, E) float32; packed: output of prepare_mhsa_params."""
    B, S, E = x.shape
    H = num_heads
    assert E % H == 0
    D = E // H
    HG, E_w, GD = packed["wq"].shape
    assert E_w == E
    G = GD // D
    assert HG * G == H

    cdt = jnp.float32 if precise else jnp.bfloat16
    tq = _pick_q_tile(S, q_tile_target)
    n_q = S // tq

    xc = x.astype(cdt)
    out_dtype = x.dtype   # keep f32 output to match the PyTorch module's dtype
    vmem_limit = _vmem_limit_bytes(S, E, tq, GD,
                                   jnp.dtype(cdt).itemsize, jnp.dtype(out_dtype).itemsize)

    kernel = functools.partial(_mhsa_kernel, heads_per_group=G, head_dim=D,
                               precise=precise)

    in_specs = [
        pl.BlockSpec((1, tq, E), lambda b, qi, h: (b, qi, 0)),      # x, query rows
        pl.BlockSpec((1, S, E), lambda b, qi, h: (b, 0, 0)),        # x, K/V rows
        pl.BlockSpec((1, E, GD), lambda b, qi, h: (h, 0, 0)),       # Wq group slice
        pl.BlockSpec((1, 1, GD), lambda b, qi, h: (h, 0, 0)),       # bq group slice
        pl.BlockSpec((1, E, 2 * GD), lambda b, qi, h: (h, 0, 0)),   # fused Wkv slice
        pl.BlockSpec((1, 1, GD), lambda b, qi, h: (h, 0, 0)),       # bv group slice
        pl.BlockSpec((1, GD, E), lambda b, qi, h: (h, 0, 0)),       # Wo group slice
        pl.BlockSpec((1, E), lambda b, qi, h: (0, 0)),              # bo
    ]

    return pl.pallas_call(
        kernel,
        out_shape=jax.ShapeDtypeStruct((B, S, E), out_dtype),
        grid_spec=pltpu.PrefetchScalarGridSpec(
            num_scalar_prefetch=0,
            grid=(B, n_q, HG),                       # head-group axis = reduction, last
            in_specs=in_specs,
            out_specs=pl.BlockSpec((1, tq, E), lambda b, qi, h: (b, qi, 0)),
            scratch_shapes=[pltpu.VMEM((tq, E), jnp.float32)],      # per-q-tile accumulator
        ),
        compiler_params=pltpu.CompilerParams(
            dimension_semantics=("parallel", "parallel", "arbitrary"),
            vmem_limit_bytes=vmem_limit,
        ),
    )(xc, xc, packed["wq"], packed["bq"], packed["wkv"], packed["bv"],
      packed["wo"], packed["bo"])


def multi_head_self_attention(x, params, *, num_heads, precise=False, group_size=None):
    """Convenience wrapper (repacks weights every call — prefer prepare + forward)."""
    packed = prepare_mhsa_params(params, num_heads=num_heads,
                                 group_size=group_size, precise=precise)
    return mhsa_forward(x, packed, num_heads=num_heads, precise=precise)


# ---------------------------------------------------------------------------
# Reference and test harness
# ---------------------------------------------------------------------------
def _reference(x, params, *, num_heads):
    """Plain-JAX f32 reference reproducing the PyTorch forward (eval mode)."""
    B, S, E = x.shape
    D = E // num_heads

    def proj(w, b):
        return x @ w + b  # (B, S, E)

    q = proj(params["wq"], params["bq"]).reshape(B, S, num_heads, D).transpose(0, 2, 1, 3)
    k = proj(params["wk"], params["bk"]).reshape(B, S, num_heads, D).transpose(0, 2, 1, 3)
    v = proj(params["wv"], params["bv"]).reshape(B, S, num_heads, D).transpose(0, 2, 1, 3)

    scores = jnp.einsum("bhqd,bhkd->bhqk", q, k) / math.sqrt(D)
    attn = jax.nn.softmax(scores, axis=-1)
    ctx = jnp.einsum("bhqk,bhkd->bhqd", attn, v)
    ctx = ctx.transpose(0, 2, 1, 3).reshape(B, S, E)
    return ctx @ params["wo"] + params["bo"]


def _init_params(key, embed_dim):
    """Deterministic init mimicking nn.Linear (uniform(-1/sqrt(in), 1/sqrt(in)))."""
    bound = 1.0 / math.sqrt(embed_dim)
    keys = jax.random.split(key, 8)

    def u(k, shape):
        return jax.random.uniform(k, shape, jnp.float32, -bound, bound)

    return {
        "wq": u(keys[0], (embed_dim, embed_dim)), "bq": u(keys[1], (1, embed_dim)),
        "wk": u(keys[2], (embed_dim, embed_dim)), "bk": u(keys[3], (1, embed_dim)),
        "wv": u(keys[4], (embed_dim, embed_dim)), "bv": u(keys[5], (1, embed_dim)),
        "wo": u(keys[6], (embed_dim, embed_dim)), "bo": u(keys[7], (1, embed_dim)),
    }


if __name__ == "__main__":
    B, S, E, H = 2, 8, 32, 4

    root = jax.random.PRNGKey(0)
    kx, kp = jax.random.split(root)
    x = jax.random.normal(kx, (B, S, E), jnp.float32)
    params = _init_params(kp, E)

    ref = _reference(x, params, num_heads=H)

    # Precise path (f32 MXU operands, exact divide) — tight structural validation.
    packed_f32 = prepare_mhsa_params(params, num_heads=H, precise=True)
    out_f32 = jax.block_until_ready(mhsa_forward(x, packed_f32, num_heads=H, precise=True))
    assert out_f32.shape == (B, S, E)
    assert jnp.allclose(out_f32, ref, atol=1e-4, rtol=1e-4), "f32 kernel mismatch"

    # Default fast path: bf16 MXU operands, f32 accumulation / softmax statistics.
    packed_bf16 = prepare_mhsa_params(params, num_heads=H)
    out = jax.block_until_ready(mhsa_forward(x, packed_bf16, num_heads=H))
    assert out.shape == (B, S, E)
    assert jnp.allclose(out, ref, atol=5e-2, rtol=5e-2), "bf16 kernel mismatch"

    print("KERNEL_OK")
</pallas_src>

<mosaic_0001>
module attributes {stable_mosaic.version = 11 : i64} {
  func.func @_mhsa_kernel(%arg0: i32, %arg1: i32, %arg2: i32, %arg3: memref<1x8x32xf32, #tpu.memory_space<vmem>>, %arg4: memref<1x8x32xf32, #tpu.memory_space<vmem>>, %arg5: memref<1x32x32xf32, #tpu.memory_space<vmem>>, %arg6: memref<1x1x32xf32, #tpu.memory_space<vmem>>, %arg7: memref<1x32x64xf32, #tpu.memory_space<vmem>>, %arg8: memref<1x1x32xf32, #tpu.memory_space<vmem>>, %arg9: memref<1x32x32xf32, #tpu.memory_space<vmem>>, %arg10: memref<1x32xf32, #tpu.memory_space<vmem>>, %arg11: memref<1x8x32xf32, #tpu.memory_space<vmem>>, %arg12: memref<8x32xf32, #tpu.memory_space<vmem>>) attributes {dimension_semantics = [#tpu.dimension_semantics<parallel>, #tpu.dimension_semantics<parallel>, #tpu.dimension_semantics<arbitrary>], iteration_bounds = array<i64: 2, 1, 1>, scalar_prefetch = 0 : i64, scratch_operands = 1 : i64, tpu.core_type = #tpu.core_type<tc>, window_params = [{transform_indices = @transform_0, window_bounds = array<i64: 1, 8, 32>}, {transform_indices = @transform_1, window_bounds = array<i64: 1, 8, 32>}, {transform_indices = @transform_2, window_bounds = array<i64: 1, 32, 32>}, {transform_indices = @transform_3, window_bounds = array<i64: 1, 1, 32>}, {transform_indices = @transform_4, window_bounds = array<i64: 1, 32, 64>}, {transform_indices = @transform_5, window_bounds = array<i64: 1, 1, 32>}, {transform_indices = @transform_6, window_bounds = array<i64: 1, 32, 32>}, {pipeline_mode = #tpu.pipeline_mode<synchronous>, transform_indices = @transform_7, window_bounds = array<i64: 1, 32>}, {transform_indices = @transform_8, window_bounds = array<i64: 1, 8, 32>}]} {
    %c0_i32 = arith.constant 0 : i32
    %0 = arith.cmpi eq, %arg2, %c0_i32 : i32
    %1 = arith.extui %0 : i1 to i32
    %c0_i32_0 = arith.constant 0 : i32
    %2 = arith.cmpi ne, %1, %c0_i32_0 : i32
    scf.if %2 {
      %cst_45 = arith.constant 0.000000e+00 : f32
      %89 = vector.broadcast %cst_45 : f32 to vector<8x32xf32>
      %c0_46 = arith.constant 0 : index
      %c0_47 = arith.constant 0 : index
      %90 = vector.load %arg12[%c0_46, %c0_47] : memref<8x32xf32, #tpu.memory_space<vmem>>, vector<8x32xf32>
      tpu.vector_store %arg12[%c0_46, %c0_47], %89 {strides = array<i32>} : memref<8x32xf32, #tpu.memory_space<vmem>>, vector<8x32xf32>,
    } else {
    }
    %c0 = arith.constant 0 : index
    %c0_1 = arith.constant 0 : index
    %c0_2 = arith.constant 0 : index
    %3 = vector.load %arg3[%c0, %c0_1, %c0_2] : memref<1x8x32xf32, #tpu.memory_space<vmem>>, vector<1x8x32xf32>
    %4 = vector.shape_cast %3 : vector<1x8x32xf32> to vector<8x32xf32>
    %c0_3 = arith.constant 0 : index
    %c0_4 = arith.constant 0 : index
    %c0_5 = arith.constant 0 : index
    %5 = vector.load %arg4[%c0_3, %c0_4, %c0_5] : memref<1x8x32xf32, #tpu.memory_space<vmem>>, vector<1x8x32xf32>
    %6 = vector.shape_cast %5 : vector<1x8x32xf32> to vector<8x32xf32>
    %c0_6 = arith.constant 0 : index
    %c0_7 = arith.constant 0 : index
    %c0_8 = arith.constant 0 : index
    %7 = vector.load %arg5[%c0_6, %c0_7, %c0_8] : memref<1x32x32xf32, #tpu.memory_space<vmem>>, vector<1x32x32xf32>
    %8 = vector.shape_cast %7 : vector<1x32x32xf32> to vector<32x32xf32>
    %cst = arith.constant dense<0.000000e+00> : vector<8x32xf32>
    %9 = tpu.matmul %4, %8, %cst {dimension_numbers = #tpu.dot_dimension_numbers<[1], [0], [0], [1], [0, 0, 1, 1], [], []>} : vector<8x32xf32>, vector<32x32xf32>, vector<8x32xf32> -> vector<8x32xf32>
    %c0_9 = arith.constant 0 : index
    %c0_10 = arith.constant 0 : index
    %c0_11 = arith.constant 0 : index
    %10 = vector.load %arg6[%c0_9, %c0_10, %c0_11] : memref<1x1x32xf32, #tpu.memory_space<vmem>>, vector<1x1x32xf32>
    %11 = vector.shape_cast %10 : vector<1x1x32xf32> to vector<1x32xf32>
    %12 = vector.broadcast %11 : vector<1x32xf32> to vector<8x32xf32>
    %13 = arith.addf %9, %12 : vector<8x32xf32>
    %c0_12 = arith.constant 0 : index
    %c0_13 = arith.constant 0 : index
    %c0_14 = arith.constant 0 : index
    %14 = vector.load %arg7[%c0_12, %c0_13, %c0_14] : memref<1x32x64xf32, #tpu.memory_space<vmem>>, vector<1x32x64xf32>
    %15 = vector.shape_cast %14 : vector<1x32x64xf32> to vector<32x64xf32>
    %cst_15 = arith.constant dense<0.000000e+00> : vector<8x64xf32>
    %16 = tpu.matmul %6, %15, %cst_15 {dimension_numbers = #tpu.dot_dimension_numbers<[1], [0], [0], [1], [0, 0, 1, 1], [], []>} : vector<8x32xf32>, vector<32x64xf32>, vector<8x64xf32> -> vector<8x64xf32>
    %17 = vector.extract_strided_slice %16 {offsets = [0, 0], sizes = [8, 32], strides = [1, 1]} : vector<8x64xf32> to vector<8x32xf32>
    %18 = vector.extract_strided_slice %16 {offsets = [0, 32], sizes = [8, 32], strides = [1, 1]} : vector<8x64xf32> to vector<8x32xf32>
    %c0_16 = arith.constant 0 : index
    %c0_17 = arith.constant 0 : index
    %c0_18 = arith.constant 0 : index
    %19 = vector.load %arg8[%c0_16, %c0_17, %c0_18] : memref<1x1x32xf32, #tpu.memory_space<vmem>>, vector<1x1x32xf32>
    %20 = vector.shape_cast %19 : vector<1x1x32xf32> to vector<1x32xf32>
    %21 = vector.broadcast %20 : vector<1x32xf32> to vector<8x32xf32>
    %22 = arith.addf %18, %21 : vector<8x32xf32>
    %23 = vector.extract_strided_slice %13 {offsets = [0, 0], sizes = [8, 8], strides = [1, 1]} : vector<8x32xf32> to vector<8x8xf32>
    %24 = vector.extract_strided_slice %17 {offsets = [0, 0], sizes = [8, 8], strides = [1, 1]} : vector<8x32xf32> to vector<8x8xf32>
    %25 = vector.extract_strided_slice %22 {offsets = [0, 0], sizes = [8, 8], strides = [1, 1]} : vector<8x32xf32> to vector<8x8xf32>
    %cst_19 = arith.constant dense<0.000000e+00> : vector<8x8xf32>
    %26 = tpu.matmul %23, %24, %cst_19 {dimension_numbers = #tpu.dot_dimension_numbers<[1], [1], [0], [0], [0, 0, 1, 0], [], []>} : vector<8x8xf32>, vector<8x8xf32>, vector<8x8xf32> -> vector<8x8xf32>
    %cst_20 = arith.constant dense<0xFF800000> : vector<8xf32>
    %27 = vector.multi_reduction <maximumf>, %26, %cst_20 [1] : vector<8x8xf32> to vector<8xf32>
    %28 = vector.shape_cast %27 : vector<8xf32> to vector<8x1xf32>
    %29 = vector.broadcast %28 : vector<8x1xf32> to vector<8x8xf32>
    %30 = arith.subf %26, %29 : vector<8x8xf32>
    %31 = math.exp %30 : vector<8x8xf32>
    %cst_21 = arith.constant dense<0.000000e+00> : vector<8xf32>
    %32 = vector.multi_reduction <add>, %31, %cst_21 [1] : vector<8x8xf32> to vector<8xf32>
    %33 = vector.shape_cast %32 : vector<8xf32> to vector<8x1xf32>
    %34 = vector.broadcast %33 : vector<8x1xf32> to vector<8x8xf32>
    %35 = arith.divf %31, %34 : vector<8x8xf32>
    %cst_22 = arith.constant dense<0.000000e+00> : vector<8x8xf32>
    %36 = tpu.matmul %35, %25, %cst_22 {dimension_numbers = #tpu.dot_dimension_numbers<[1], [0], [0], [1], [0, 0, 1, 1], [], []>} : vector<8x8xf32>, vector<8x8xf32>, vector<8x8xf32> -> vector<8x8xf32>
    %37 = vector.extract_strided_slice %13 {offsets = [0, 8], sizes = [8, 8], strides = [1, 1]} : vector<8x32xf32> to vector<8x8xf32>
    %38 = vector.extract_strided_slice %17 {offsets = [0, 8], sizes = [8, 8], strides = [1, 1]} : vector<8x32xf32> to vector<8x8xf32>
    %39 = vector.extract_strided_slice %22 {offsets = [0, 8], sizes = [8, 8], strides = [1, 1]} : vector<8x32xf32> to vector<8x8xf32>
    %cst_23 = arith.constant dense<0.000000e+00> : vector<8x8xf32>
    %40 = tpu.matmul %37, %38, %cst_23 {dimension_numbers = #tpu.dot_dimension_numbers<[1], [1], [0], [0], [0, 0, 1, 0], [], []>} : vector<8x8xf32>, vector<8x8xf32>, vector<8x8xf32> -> vector<8x8xf32>
    %cst_24 = arith.constant dense<0xFF800000> : vector<8xf32>
    %41 = vector.multi_reduction <maximumf>, %40, %cst_24 [1] : vector<8x8xf32> to vector<8xf32>
    %42 = vector.shape_cast %41 : vector<8xf32> to vector<8x1xf32>
    %43 = vector.broadcast %42 : vector<8x1xf32> to vector<8x8xf32>
    %44 = arith.subf %40, %43 : vector<8x8xf32>
    %45 = math.exp %44 : vector<8x8xf32>
    %cst_25 = arith.constant dense<0.000000e+00> : vector<8xf32>
    %46 = vector.multi_reduction <add>, %45, %cst_25 [1] : vector<8x8xf32> to vector<8xf32>
    %47 = vector.shape_cast %46 : vector<8xf32> to vector<8x1xf32>
    %48 = vector.broadcast %47 : vector<8x1xf32> to vector<8x8xf32>
    %49 = arith.divf %45, %48 : vector<8x8xf32>
    %cst_26 = arith.constant dense<0.000000e+00> : vector<8x8xf32>
    %50 = tpu.matmul %49, %39, %cst_26 {dimension_numbers = #tpu.dot_dimension_numbers<[1], [0], [0], [1], [0, 0, 1, 1], [], []>} : vector<8x8xf32>, vector<8x8xf32>, vector<8x8xf32> -> vector<8x8xf32>
    %51 = vector.extract_strided_slice %13 {offsets = [0, 16], sizes = [8, 8], strides = [1, 1]} : vector<8x32xf32> to vector<8x8xf32>
    %52 = vector.extract_strided_slice %17 {offsets = [0, 16], sizes = [8, 8], strides = [1, 1]} : vector<8x32xf32> to vector<8x8xf32>
    %53 = vector.extract_strided_slice %22 {offsets = [0, 16], sizes = [8, 8], strides = [1, 1]} : vector<8x32xf32> to vector<8x8xf32>
    %cst_27 = arith.constant dense<0.000000e+00> : vector<8x8xf32>
    %54 = tpu.matmul %51, %52, %cst_27 {dimension_numbers = #tpu.dot_dimension_numbers<[1], [1], [0], [0], [0, 0, 1, 0], [], []>} : vector<8x8xf32>, vector<8x8xf32>, vector<8x8xf32> -> vector<8x8xf32>
    %cst_28 = arith.constant dense<0xFF800000> : vector<8xf32>
    %55 = vector.multi_reduction <maximumf>, %54, %cst_28 [1] : vector<8x8xf32> to vector<8xf32>
    %56 = vector.shape_cast %55 : vector<8xf32> to vector<8x1xf32>
    %57 = vector.broadcast %56 : vector<8x1xf32> to vector<8x8xf32>
    %58 = arith.subf %54, %57 : vector<8x8xf32>
    %59 = math.exp %58 : vector<8x8xf32>
    %cst_29 = arith.constant dense<0.000000e+00> : vector<8xf32>
    %60 = vector.multi_reduction <add>, %59, %cst_29 [1] : vector<8x8xf32> to vector<8xf32>
    %61 = vector.shape_cast %60 : vector<8xf32> to vector<8x1xf32>
    %62 = vector.broadcast %61 : vector<8x1xf32> to vector<8x8xf32>
    %63 = arith.divf %59, %62 : vector<8x8xf32>
    %cst_30 = arith.constant dense<0.000000e+00> : vector<8x8xf32>
    %64 = tpu.matmul %63, %53, %cst_30 {dimension_numbers = #tpu.dot_dimension_numbers<[1], [0], [0], [1], [0, 0, 1, 1], [], []>} : vector<8x8xf32>, vector<8x8xf32>, vector<8x8xf32> -> vector<8x8xf32>
    %65 = vector.extract_strided_slice %13 {offsets = [0, 24], sizes = [8, 8], strides = [1, 1]} : vector<8x32xf32> to vector<8x8xf32>
    %66 = vector.extract_strided_slice %17 {offsets = [0, 24], sizes = [8, 8], strides = [1, 1]} : vector<8x32xf32> to vector<8x8xf32>
    %67 = vector.extract_strided_slice %22 {offsets = [0, 24], sizes = [8, 8], strides = [1, 1]} : vector<8x32xf32> to vector<8x8xf32>
    %cst_31 = arith.constant dense<0.000000e+00> : vector<8x8xf32>
    %68 = tpu.matmul %65, %66, %cst_31 {dimension_numbers = #tpu.dot_dimension_numbers<[1], [1], [0], [0], [0, 0, 1, 0], [], []>} : vector<8x8xf32>, vector<8x8xf32>, vector<8x8xf32> -> vector<8x8xf32>
    %cst_32 = arith.constant dense<0xFF800000> : vector<8xf32>
    %69 = vector.multi_reduction <maximumf>, %68, %cst_32 [1] : vector<8x8xf32> to vector<8xf32>
    %70 = vector.shape_cast %69 : vector<8xf32> to vector<8x1xf32>
    %71 = vector.broadcast %70 : vector<8x1xf32> to vector<8x8xf32>
    %72 = arith.subf %68, %71 : vector<8x8xf32>
    %73 = math.exp %72 : vector<8x8xf32>
    %cst_33 = arith.constant dense<0.000000e+00> : vector<8xf32>
    %74 = vector.multi_reduction <add>, %73, %cst_33 [1] : vector<8x8xf32> to vector<8xf32>
    %75 = vector.shape_cast %74 : vector<8xf32> to vector<8x1xf32>
    %76 = vector.broadcast %75 : vector<8x1xf32> to vector<8x8xf32>
    %77 = arith.divf %73, %76 : vector<8x8xf32>
    %cst_34 = arith.constant dense<0.000000e+00> : vector<8x8xf32>
    %78 = tpu.matmul %77, %67, %cst_34 {dimension_numbers = #tpu.dot_dimension_numbers<[1], [0], [0], [1], [0, 0, 1, 1], [], []>} : vector<8x8xf32>, vector<8x8xf32>, vector<8x8xf32> -> vector<8x8xf32>
    %79 = tpu.concatenate %36, %50, %64, %78 in 1 : vector<8x8xf32>, vector<8x8xf32>, vector<8x8xf32>, vector<8x8xf32> -> vector<8x32xf32>
    %c0_35 = arith.constant 0 : index
    %c0_36 = arith.constant 0 : index
    %80 = vector.load %arg12[%c0_35, %c0_36] : memref<8x32xf32, #tpu.memory_space<vmem>>, vector<8x32xf32>
    %c0_37 = arith.constant 0 : index
    %c0_38 = arith.constant 0 : index
    %c0_39 = arith.constant 0 : index
    %81 = vector.load %arg9[%c0_37, %c0_38, %c0_39] : memref<1x32x32xf32, #tpu.memory_space<vmem>>, vector<1x32x32xf32>
    %82 = vector.shape_cast %81 : vector<1x32x32xf32> to vector<32x32xf32>
    %cst_40 = arith.constant dense<0.000000e+00> : vector<8x32xf32>
    %83 = tpu.matmul %79, %82, %cst_40 {dimension_numbers = #tpu.dot_dimension_numbers<[1], [0], [0], [1], [0, 0, 1, 1], [], []>} : vector<8x32xf32>, vector<32x32xf32>, vector<8x32xf32> -> vector<8x32xf32>
    %84 = arith.addf %80, %83 : vector<8x32xf32>
    %c0_41 = arith.constant 0 : index
    %c0_42 = arith.constant 0 : index
    %85 = vector.load %arg12[%c0_41, %c0_42] : memref<8x32xf32, #tpu.memory_space<vmem>>, vector<8x32xf32>
    tpu.vector_store %arg12[%c0_41, %c0_42], %84 {strides = array<i32>} : memref<8x32xf32, #tpu.memory_space<vmem>>, vector<8x32xf32>,
    %c0_i32_43 = arith.constant 0 : i32
    %86 = arith.cmpi eq, %arg2, %c0_i32_43 : i32
    %87 = arith.extui %86 : i1 to i32
    %c0_i32_44 = arith.constant 0 : i32
    %88 = arith.cmpi ne, %87, %c0_i32_44 : i32
    scf.if %88 {
      %c0_45 = arith.constant 0 : index
      %c0_46 = arith.constant 0 : index
      %89 = vector.load %arg12[%c0_45, %c0_46] : memref<8x32xf32, #tpu.memory_space<vmem>>, vector<8x32xf32>
      %c0_47 = arith.constant 0 : index
      %c0_48 = arith.constant 0 : index
      %90 = vector.load %arg10[%c0_47, %c0_48] : memref<1x32xf32, #tpu.memory_space<vmem>>, vector<1x32xf32>
      %91 = vector.broadcast %90 : vector<1x32xf32> to vector<8x32xf32>
      %92 = arith.addf %89, %91 : vector<8x32xf32>
      %c0_49 = arith.constant 0 : index
      %c0_50 = arith.constant 0 : index
      %c0_51 = arith.constant 0 : index
      %93 = vector.load %arg11[%c0_49, %c0_50, %c0_51] : memref<1x8x32xf32, #tpu.memory_space<vmem>>, vector<1x8x32xf32>
      %94 = vector.shape_cast %93 : vector<1x8x32xf32> to vector<8x32xf32>
      %95 = vector.shape_cast %92 : vector<8x32xf32> to vector<1x8x32xf32>
      tpu.vector_store %arg11[%c0_49, %c0_50, %c0_51], %95 {strides = array<i32>} : memref<1x8x32xf32, #tpu.memory_space<vmem>>, vector<1x8x32xf32>,
    } else {
    }
    return
  }
  func.func @transform_0(%arg0: i32, %arg1: i32, %arg2: i32) -> (i32, i32, i32) {
    %c0_i32 = arith.constant 0 : i32
    %c0_i32_0 = arith.constant 0 : i32
    return %arg0, %arg1, %c0_i32 : i32, i32, i32
  }
  func.func @transform_1(%arg0: i32, %arg1: i32, %arg2: i32) -> (i32, i32, i32) {
    %c0_i32 = arith.constant 0 : i32
    %c0_i32_0 = arith.constant 0 : i32
    %c0_i32_1 = arith.constant 0 : i32
    return %arg0, %c0_i32, %c0_i32_0 : i32, i32, i32
  }
  func.func @transform_2(%arg0: i32, %arg1: i32, %arg2: i32) -> (i32, i32, i32) {
    %c0_i32 = arith.constant 0 : i32
    %c0_i32_0 = arith.constant 0 : i32
    %c0_i32_1 = arith.constant 0 : i32
    return %arg2, %c0_i32, %c0_i32_0 : i32, i32, i32
  }
  func.func @transform_3(%arg0: i32, %arg1: i32, %arg2: i32) -> (i32, i32, i32) {
    %c0_i32 = arith.constant 0 : i32
    %c0_i32_0 = arith.constant 0 : i32
    %c0_i32_1 = arith.constant 0 : i32
    return %arg2, %c0_i32, %c0_i32_0 : i32, i32, i32
  }
  func.func @transform_4(%arg0: i32, %arg1: i32, %arg2: i32) -> (i32, i32, i32) {
    %c0_i32 = arith.constant 0 : i32
    %c0_i32_0 = arith.constant 0 : i32
    %c0_i32_1 = arith.constant 0 : i32
    return %arg2, %c0_i32, %c0_i32_0 : i32, i32, i32
  }
  func.func @transform_5(%arg0: i32, %arg1: i32, %arg2: i32) -> (i32, i32, i32) {
    %c0_i32 = arith.constant 0 : i32
    %c0_i32_0 = arith.constant 0 : i32
    %c0_i32_1 = arith.constant 0 : i32
    return %arg2, %c0_i32, %c0_i32_0 : i32, i32, i32
  }
  func.func @transform_6(%arg0: i32, %arg1: i32, %arg2: i32) -> (i32, i32, i32) {
    %c0_i32 = arith.constant 0 : i32
    %c0_i32_0 = arith.constant 0 : i32
    %c0_i32_1 = arith.constant 0 : i32
    return %arg2, %c0_i32, %c0_i32_0 : i32, i32, i32
  }
  func.func @transform_7(%arg0: i32, %arg1: i32, %arg2: i32) -> (i32, i32) {
    %c0_i32 = arith.constant 0 : i32
    %c0_i32_0 = arith.constant 0 : i32
    %c0_i32_1 = arith.constant 0 : i32
    return %c0_i32, %c0_i32_0 : i32, i32
  }
  func.func @transform_8(%arg0: i32, %arg1: i32, %arg2: i32) -> (i32, i32, i32) {
    %c0_i32 = arith.constant 0 : i32
    %c0_i32_0 = arith.constant 0 : i32
    return %arg0, %arg1, %c0_i32 : i32, i32, i32
  }
}

</mosaic_0001>

<bundles_post_ra>
// kernel: tpu_custom_call.1
= control target key start
LH: loop header
LB: loop body
LE: loop exit
PB: predicated region body
PF: predicated region fallthrough
CT: control target
= control target key end

     0   :  { %s2612_s0 = inlined_call_operand.hbm [shape: f32[2,8,32], index: 0, kind: input, shape index: {}]   ;;  %s2613_s1 = inlined_call_operand.hbm [shape: f32[2,8,32], index: 1, kind: input, shape index: {}]   ;;  %s2614_s2 = inlined_call_operand.hbm [shape: f32[1,32,32], index: 2, kind: input, shape index: {}]   ;;  %s2615_s3 = inlined_call_operand.vmem [shape: f32[1,1,32], index: 3, kind: input, shape index: {}]   ;;  %s2616_s4 = inlined_call_operand.hbm [shape: f32[1,32,64], index: 4, kind: input, shape index: {}]   ;;  %s2617_s5 = inlined_call_operand.vmem [shape: f32[1,1,32], index: 5, kind: input, shape index: {}]   ;;  %s2618_s6 = inlined_call_operand.hbm [shape: f32[1,32,32], index: 6, kind: input, shape index: {}]   ;;  %s2619_s7 = inlined_call_operand.vmem [shape: f32[1,32], index: 7, kind: input, shape index: {}]   ;;  %s2620_s8 = inlined_call_operand.hbm [shape: f32[2,8,32], index: 8, kind: output, shape index: {}]  }
   0x1   :  { %2628 = sst [smem:[#allocation20_spill]] %s2614_s2 }
   0x2   :  { %2629 = sst [smem:[#allocation21_spill]] %s2616_s4 }
   0x3   :  { %2630 = sst [smem:[#allocation22_spill]] %s2618_s6 }
   0x4   :  { %2631 = sst [smem:[#allocation23_spill]] %s2619_s7 }
   0x5   :  { %2632 = sst [smem:[#allocation24_spill]] %s2620_s8 }
   0x6   :  { %13 = vsyncpa [#allocation4], 0 }
   0x7   :  { %15 = vsyncpa [#allocation4 + $0x1], 0 }
   0x8   :  { %16 = vsyncpa [#allocation7], 0 }
   0x9   :  { %18 = vsyncpa [#allocation7 + $0x1], 0 }
   0xa   :  { %19 = vsyncpa [#allocation10], 0 }
   0xb   :  { %20 = vsyncpa [#allocation5], 0 }
   0xc   :  { %22 = vsyncpa [#allocation5 + $0x1], 0  ;;  %s2207_s27 = smov 0   ;;  %s2209_s28 = smov 0  }
   0xd   :  { %s2211_s29 = smov 0   ;;  %s2213_s30 = smov 0  }
   0xe   :  { %s2215_s9 = smov 0   ;;  %s2217_s10 = smov 0  }
   0xf LB: > { %2633 = sst [smem:[#allocation18_spill]] %s2118_s27  ;;  %s2238_s11 = sadd.s32 4294967295, %s2138_s10   ;;  %s2138_s10 = sphi %s2217_s10, %s28_s10   ;;  %s2134_s9 = sphi %s2215_s9, %s2663_s9   ;;  %s2130_s30 = sphi %s2213_s30, %s2662_s30   ;;  %s2126_s29 = sphi %s2211_s29, %s2661_s29   ;;  %s2122_s28 = sphi %s2209_s28, %s2660_s28   ;;  %s2118_s27 = sphi %s2207_s27, %s2659_s27  }
  0x10   : > { %s1607_s12 = sadd.s32 4294967294, %s2138_s10   ;;  %p69_p0 = scmp.ne.s32.totalorder %s2122_s28, %s2118_s27 }
  0x11   : > { %p2621_p1 = scmp.eq.s32.totalorder %s2238_s11, 0  ;;  %p278_p3 = scmp.eq.s32.totalorder %s1607_s12, 1 }
  0x12   : > { %p1608_p5 = scmp.ge.s32.totalorder %s2138_s10, 1  ;;  %p285_p7 = scmp.lt.s32.totalorder %s2138_s10, 3 }
  0x13   : > { %p2247_p4 = por %p2621_p1, %p69_p0  ;;  %p2252_p6 = por %p278_p3, %p69_p0 }
  0x14   : > { %p2257_p8 = pnand %p1608_p5, %p285_p7  ;;  %s2140_s16 = smov [#allocation8]  }
  0x15   : > { %s2634_s13 = scalar_select %p2247_p4, 1, 0 }
  0x16   : > { %s2635_s14 = scalar_select %p2252_p6, 1, 0 }
  0x17   : > { %s2637_s15 = scalar_select %p2257_p8, 1, 0 }
  0x18   : > { %2636 = sst [smem:[#allocation19_spill]] %s2635_s14  ;;  %s300_s17 = sshll.u32 %s2140_s16, 4  ;;  %s2261_s17 = int_to_ptr.vmem [resolvable:$true] %s300_s17 }
  0x19   : > { %p1788_p9 = pneg %p2257_p8  ;;  %s2141_s19 = smov [#allocation9]  }
  0x1a   : > { %s322_s20 = sshll.u32 %s2141_s19, 4  ;;  %s2142_s21 = smov [#allocation11]   ;;  %s2272_s20 = int_to_ptr.vmem [resolvable:$true] %s322_s20 }
  0x1b   : > { %p2268_p11 = pnand %p1788_p9, %p2621_p1  ;;  %s2274_s22 = sshll.u32 %s2142_s21, 4  ;;  %s345_s22 = int_to_ptr.vmem [resolvable:$true] %s2274_s22 }
  0x1c   : > { %s2639_s2 = sld [smem:[#allocation20_spill]] }
  0x1d   : > { %p2284_p13 = pneg %p2268_p11 }
  0x22   : > { %s1900_s25 = scalar_lea.hbm %s2639_s2, 512 }
  0x23   : > { %p1901_p12 = scmp.ne.s32.totalorder %s2639_s2, %s1900_s25  ;;  %p1907_p5 = scmp.lt.u32.totalorder %s1900_s25, %s2639_s2 }
  0x25   : > { %p1903_p0 = pnand %p2284_p13, %p1901_p12 }
  0x27   : > { %p1904_p3 = pneg %p1903_p0 }
  0x29   : > { %p1909_p7 = pnand %p1907_p5, %p1904_p3 }
  0x2b   : > { %1912 = shalt.err (!%p1909_p7)
}
  0x2c   : > { %s1913_s23 = scalar_lea.vmem %s2261_s17, 512  ;;  %p1921_p2 = scmp.lt.s32.totalorder %s2261_s17, %s2261_s17 }
  0x2d   : > { %p1914_p9 = scmp.ne.s32.totalorder %s2261_s17, %s1913_s23  ;;  %p1922_p6 = scmp.lt.s32.totalorder %s1913_s23, %s1913_s23 }
  0x2f   : > { %p1916_p10 = pnand %p1914_p9, %p2284_p13  ;;  %p1923_p12 = por %p1922_p6, %p1921_p2 }
  0x31   : > { %p1917_p1 = pneg %p1916_p10 }
  0x33   : > { %p1924_p0 = pnand %p1923_p12, %p1917_p1 }
  0x35   : > { %1927 = shalt.err (!%p1924_p0)
}
  0x36   : > { %s2143_s24 = smov 128   ;;  %s2144_s25 = smov 8  }
  0x37   : > { %1791 = dma.hbm_to_vmem [thread:$0]  (!%p2268_p11), %s2639_s2, 512, %s2261_s17, [#allocation7], %s2143_s24, %s2143_s24, %s2144_s25  }
  0x38   : > { %s2641_s4 = sld [smem:[#allocation21_spill]] }
  0x3e   : > { %s1928_s23 = scalar_lea.hbm %s2641_s4, 512 }
  0x3f   : > { %p1929_p1 = scmp.ne.s32.totalorder %s2641_s4, %s1928_s23  ;;  %p1935_p10 = scmp.lt.u32.totalorder %s1928_s23, %s2641_s4 }
  0x41   : > { %p1931_p2 = pnand %p1929_p1, %p2284_p13 }
  0x43   : > { %p1932_p6 = pneg %p1931_p2 }
  0x45   : > { %p1937_p3 = pnand %p1935_p10, %p1932_p6 }
  0x47   : > { %1940 = shalt.err (!%p1937_p3)
}
  0x48   : > { %s1941_s17 = scalar_lea.vmem %s2272_s20, 512  ;;  %p1949_p12 = scmp.lt.s32.totalorder %s2272_s20, %s2272_s20 }
  0x49   : > { %p1942_p5 = scmp.ne.s32.totalorder %s2272_s20, %s1941_s17  ;;  %p1950_p0 = scmp.lt.s32.totalorder %s1941_s17, %s1941_s17 }
  0x4b   : > { %p1944_p7 = pnand %p1942_p5, %p2284_p13  ;;  %p1951_p1 = por %p1950_p0, %p1949_p12 }
  0x4d   : > { %p1945_p9 = pneg %p1944_p7 }
  0x4f   : > { %p1952_p2 = pnand %p1951_p1, %p1945_p9 }
  0x51   : > { %1955 = shalt.err (!%p1952_p2)
}
  0x52   : > { %1794 = dma.hbm_to_vmem [thread:$0]  (!%p2268_p11), %s2641_s4, 512, %s2272_s20, [#allocation10], %s2143_s24, %s2143_s24, %s2144_s25  }
  0x53   : > { %s2642_s6 = sld [smem:[#allocation22_spill]] }
  0x59   : > { %s1956_s26 = scalar_lea.hbm %s2642_s6, 512 }
  0x5a   : > { %p1957_p6 = scmp.ne.s32.totalorder %s2642_s6, %s1956_s26  ;;  %p1963_p5 = scmp.lt.u32.totalorder %s1956_s26, %s2642_s6 }
  0x5c   : > { %p1959_p10 = pnand %p1957_p6, %p2284_p13 }
  0x5e   : > { %p1960_p3 = pneg %p1959_p10 }
  0x60   : > { %p1965_p7 = pnand %p1963_p5, %p1960_p3 }
  0x62   : > { %1968 = shalt.err (!%p1965_p7)
}
  0x63   : > { %s1969_s17 = scalar_lea.vmem %s345_s22, 512  ;;  %p1977_p1 = scmp.lt.s32.totalorder %s345_s22, %s345_s22 }
  0x64   : > { %p1970_p9 = scmp.ne.s32.totalorder %s345_s22, %s1969_s17  ;;  %p1978_p2 = scmp.lt.s32.totalorder %s1969_s17, %s1969_s17 }
  0x66   : > { %p1972_p12 = pnand %p1970_p9, %p2284_p13  ;;  %p1979_p4 = por %p1978_p2, %p1977_p1 }
  0x68   : > { %p1973_p0 = pneg %p1972_p12 }
  0x6a   : > { %p1980_p8 = pnand %p1979_p4, %p1973_p0 }
  0x6c   : > { %1983 = shalt.err (!%p1980_p8)
}
  0x6d   : > { %1797 = dma.hbm_to_vmem [thread:$0]  (!%p2268_p11), %s2642_s6, 512, %s345_s22, [#allocation10], %s2143_s24, %s2143_s24, %s2144_s25  }
  0x6e   : > { %s56_s16 = sadd.s32 1, %s2126_s29  ;;  %s47_s18 = sadd.s32 1, %s2134_s9 }
  0x6f   : > { %p63_p4 = scmp.ne.s32.totalorder %s2126_s29, %s2122_s28  ;;  %p49_p8 = scmp.ge.s32.totalorder %s47_s18, 2 }
  0x70   : > { %p64_p13 = scmp.eq.s32.totalorder %s2138_s10, 0  ;;  %p2643_p6 = scmp.eq.s32.totalorder %s2238_s11, 1 }
  0x71   : > { %p1812_p3 = scmp.lt.s32.totalorder %s2138_s10, 2  ;;  %s2665_s18 = smov (%p49_p8, %s47_s18), 0 }
  0x72   : > { %p2363_p10 = por %p2643_p6, %p63_p4  ;;  %p65_p5 = por %p64_p13, %p63_p4 }
  0x73   : > { %s361_s27 = sand.u32 1, %s2126_s29   ;;  %s51_s14 = ssub.s32 %s2134_s9, %s2665_s18 }
  0x74   : > { %s2644_s8 = scalar_select %p2363_p10, 1, 0 }
  0x75   : > { %p54_p11 = scmp.eq.s32.totalorder %s51_s14, 0  ;;  %s2373_s22 = sshll.u32 %s361_s27, 3 }
  0x76   : > { %s1616_s24 = sshll.u32 %s2134_s9, 7  ;;  %s365_s21 = scalar_lea.vmem [#allocation3], %s2373_s22 }
  0x77   : > { %s2377_s25 = scalar_select %p54_p11, %s2126_s29, %s56_s16  }
  0x78   : > { %s2382_s19 = scalar_lea.hbm %s2612_s0, %s1616_s24  ;;  %s373_s23 = sshll.u32 %s365_s21, 4  ;;  %s2385_s23 = int_to_ptr.vmem [resolvable:$true] %s373_s23 }
  0x79   : > { %p2389_p7 = pnand %p1812_p3, %p65_p5  ;;  %s2396_s16 = scalar_lea.hbm %s2613_s1, %s1616_s24 }
  0x7a   : > { %s380_s14 = sand.u32 1, %s2138_s10   ;;  %s362_s26 = scalar_lea.sflag [#allocation4], %s361_s27 }
  0x7b   : > { %s1984_s12 = scalar_lea.hbm %s2382_s19, 128  ;;  %p1986_p12 = pneg %p2389_p7 }
  0x7c   : > { %p1985_p9 = scmp.ne.s32.totalorder %s2382_s19, %s1984_s12  ;;  %s1989_s4 = scalar_lea.hbm %s2612_s0, 256 }
  0x7d   : > { %p1990_p2 = scmp.lt.u32.totalorder %s2382_s19, %s2612_s0  ;;  %p1991_p4 = scmp.lt.u32.totalorder %s1989_s4, %s1984_s12 }
  0x7e   : > { %p1987_p0 = pnand %p1986_p12, %p1985_p9  ;;  %p1993_p13 = scmp.lt.u32.totalorder %s1984_s12, %s2382_s19 }
  0x7f   : > { %p1992_p8 = por %p1991_p4, %p1990_p2 }
  0x80   : > { %p1988_p1 = pneg %p1987_p0 }
  0x81   : > { %p1994_p6 = por %p1993_p13, %p1992_p8 }
  0x83   : > { %p1995_p3 = pnand %p1994_p6, %p1988_p1 }
  0x85   : > { %1998 = shalt.err (!%p1995_p3)
}
  0x86   : > { %s1999_s27 = scalar_lea.vmem %s2385_s23, 128  ;;  %s2145_s2 = smov [#allocation3]  }
  0x87   : > { %p2000_p5 = scmp.ne.s32.totalorder %s2385_s23, %s1999_s27  ;;  %s2004_s24 = sshll.u32 %s2145_s2, 4  ;;  %s2005_s24 = int_to_ptr.vmem [resolvable:$false] %s2004_s24 }
  0x88   : > { %s2006_s6 = scalar_lea.vmem %s2005_s24, 256  ;;  %p2007_p0 = scmp.lt.s32.totalorder %s2385_s23, %s2005_s24 }
  0x89   : > { %p2002_p11 = pnand %p2000_p5, %p1986_p12  ;;  %p2008_p2 = scmp.lt.s32.totalorder %s2006_s6, %s1999_s27 }
  0x8b   : > { %p2003_p9 = pneg %p2002_p11  ;;  %p2009_p4 = por %p2008_p2, %p2007_p0 }
  0x8d   : > { %p2010_p8 = pnand %p2009_p4, %p2003_p9 }
  0x8f   : > { %2013 = shalt.err (!%p2010_p8)
}
  0x90   : > { %1801 = dma.hbm_to_vmem [thread:$0]  (!%p2389_p7), %s2382_s19, 128, %s2385_s23, %s362_s26  }
  0x91   : > { %s384_s4 = scalar_lea.vmem [#allocation6], %s2373_s22  ;;  %s381_s12 = scalar_lea.sflag [#allocation7], %s380_s14 }
  0x92   : > { %s391_s7 = sshll.u32 %s384_s4, 4  ;;  %s2014_s21 = scalar_lea.hbm %s2396_s16, 128  ;;  %s392_s7 = int_to_ptr.vmem [resolvable:$true] %s391_s7 }
  0x93   : > { %p2015_p1 = scmp.ne.s32.totalorder %s2396_s16, %s2014_s21  ;;  %s2019_s2 = scalar_lea.hbm %s2613_s1, 256 }
  0x94   : > { %p2020_p3 = scmp.lt.u32.totalorder %s2396_s16, %s2613_s1  ;;  %p2021_p5 = scmp.lt.u32.totalorder %s2019_s2, %s2014_s21 }
  0x95   : > { %p2017_p13 = pnand %p2015_p1, %p1986_p12  ;;  %p2023_p9 = scmp.lt.u32.totalorder %s2014_s21, %s2396_s16 }
  0x96   : > { %p2022_p11 = por %p2021_p5, %p2020_p3 }
  0x97   : > { %p2018_p6 = pneg %p2017_p13 }
  0x98   : > { %p2024_p0 = por %p2023_p9, %p2022_p11 }
  0x9a   : > { %p2025_p2 = pnand %p2024_p0, %p2018_p6 }
  0x9c   : > { %2028 = shalt.err (!%p2025_p2)
}
  0x9d   : > { %s2029_s22 = scalar_lea.vmem %s392_s7, 128  ;;  %s2146_s19 = smov [#allocation6]  }
  0x9e   : > { %p2030_p4 = scmp.ne.s32.totalorder %s392_s7, %s2029_s22  ;;  %s2034_s23 = sshll.u32 %s2146_s19, 4  ;;  %s2035_s23 = int_to_ptr.vmem [resolvable:$false] %s2034_s23 }
  0x9f   : > { %s2036_s14 = scalar_lea.vmem %s2035_s23, 256  ;;  %p2037_p13 = scmp.lt.s32.totalorder %s392_s7, %s2035_s23 }
  0xa0   : > { %p2032_p8 = pnand %p2030_p4, %p1986_p12  ;;  %p2038_p10 = scmp.lt.s32.totalorder %s2036_s14, %s2029_s22 }
  0xa2   : > { %p2033_p1 = pneg %p2032_p8  ;;  %p2039_p3 = por %p2038_p10, %p2037_p13 }
  0xa4   : > { %p2040_p5 = pnand %p2039_p3, %p2033_p1 }
  0xa6   : > { %2043 = shalt.err (!%p2040_p5)
}
  0xa7   : > { %1804 = dma.hbm_to_vmem [thread:$0]  (!%p2389_p7), %s2396_s16, 128, %s392_s7, %s381_s12  }
  0xa8   : > { %p2646_p6 = scmp.ne.s32.totalorder %s2637_s15, 0 }
  0xa9   : > { %s2449_s26 = sand.u32 (!%p2646_p6), 1, %s2122_s28   ;;  %p2647_p10 = scmp.ne.s32.totalorder (!%p2646_p6), %s2634_s13, 0 }
  0xaa   : > { %400 = sbr.rel (%p2646_p6) target bundleno = 1629 (0x65d), region = 52  ;;  %s2452_s4 = sshll.u32 (!%p2646_p6), %s2449_s26, 3 }
  0xab   : > { %s403_s21 = scalar_lea.sflag (!%p2646_p6), [#allocation4], %s2449_s26  ;;  %s406_s20 = scalar_lea.vmem (!%p2646_p6), [#allocation3], %s2452_s4 }
  0xb1   : > { %2097 = dma.done.wait (%p2647_p10), %s403_s21, 128  }
  0xb2   : > { %2099 = vsyncadd (%p2647_p10), %s403_s21, 4294967168  ;;  %s411_s15 = sand.u32 1, %s2238_s11   ;;  %s415_s16 = scalar_lea.vmem [#allocation6], %s2452_s4 }
  0xb3   : > { %s412_s17 = scalar_lea.sflag [#allocation7], %s411_s15 }
  0xb4   : > { %2101 = dma.done.wait (%p2647_p10), %s412_s17, 128  }
  0xb5   : > { %2103 = vsyncadd (%p2647_p10), %s412_s17, 4294967168  ;;  %p2648_p7 = scmp.eq.s32.totalorder %s2238_s11, 0 }
  0xb7   : > { %2105 = dma.done.wait (%p2648_p7), [#allocation7], 512   ;;  %p2649_p12 = pmov %p2648_p7 }
  0xb8   : > { %p2650_p11 = pmov %p2648_p7 }
  0xb9   : > { %2107 = vsyncadd (%p2649_p12), [#allocation7], 4294966784 }
  0xba   : > { %2109 = dma.done.wait (%p2650_p11), [#allocation10], 1024   ;;  %p2651_p9 = pmov %p2648_p7 }
  0xbb   : > { %vm481_vm0 = vcmask 261120   ;;  %v2147_v0 = vmov 0.0|0.0   ;;  %v2148_v1 = vmov 0.0   ;;  %vm2149_vm1 = vmmov 0   ;;  %v570_v2 = vld [vmem:[#allocation9] sm:$0xff]  ;;  %v571_v3 = vld [vmem:[#allocation9 + $0x8] sm:$0xff] }
  0xbc   : > { %2111 = vsyncadd (%p2651_p9), [#allocation10], 4294966272  ;;  %1758 = vmatprep.subr.bf16.mxu1 %v2147_v0  ;;  %1752 = vmatprep.subr.bf16.mxu0 %v2147_v0  ;;  %482 = vst.msk [vmem:[#allocation2] sm:$0xff] %vm481_vm0, %v2148_v1  ;;  %v485_v4 = vld [vmem:[#allocation8] sm:$0xff]  ;;  %v1759_v5 = vpack.c.bf16 %v571_v3, %v570_v2  ;;  %v486_v6 = vld [vmem:[#allocation8 + $0x8] sm:$0xff]  ;;  %vm657_vm2 = vcmask 64512  }
  0xbd   : > { %1698 = vmatprep.mubr.msk.f32.mxu1 %vm2149_vm1, %v2148_v1  ;;  %1687 = vmatprep.mubr.msk.f32.mxu0 %vm2149_vm1, %v2148_v1  ;;  %v572_v7 = vld [vmem:[#allocation9 + $0x10] sm:$0xff]  ;;  %v573_v8 = vld [vmem:[#allocation9 + $0x18] sm:$0xff]  ;;  %v1753_v9 = vpack.c.bf16 %v486_v6, %v485_v4  ;;  %v483_v15 = vld [vmem:[%s406_s20] sm:$0xff]  ;;  %s2150_s7 = smov 112   ;;  %s2151_s12 = smov 120   ;;  %vm1330_vm3 = vcmask 130048  }
  0xbe   : > { %v487_v10 = vld [vmem:[#allocation8 + $0x10] sm:$0xff]  ;;  %v488_v11 = vld [vmem:[#allocation8 + $0x18] sm:$0xff]  ;;  %1760 = vmatpush3.bf16.msra.mxu1 %v1759_v5  ;;  %v1762_v12 = vpack.c.bf16 %v573_v8, %v572_v7  ;;  %s2152_s27 = smov 104   ;;  %s2153_s6 = smov 32   ;;  %vm1332_vm4 = vcmask 195584  }
  0xbf   : > { %1754 = vmatpush3.bf16.msra.mxu0 %v1753_v9  ;;  %1761 = vmatprep.subr.bf16.mxu1 %v2147_v0  ;;  %v1756_v13 = vpack.c.bf16 %v488_v11, %v487_v10  ;;  %v484_v14 = vld [vmem:[%s415_s16] sm:$0xff]  ;;  %s2154_s22 = smov 96   ;;  %s2155_s19 = smov 80  }
  0xc0   : > { %1755 = vmatprep.subr.bf16.mxu0 %v2147_v0  ;;  %v1626_v16 = vld [vmem:[%s2615_s3] ss:$0 sm:$0xff]  ;;  %s2156_s23 = smov 72   ;;  %s2157_s14 = smov 88  }
  0xc1   : > { %v1629_v40 = vld [vmem:[%s2617_s5] ss:$0 sm:$0xff]  ;;  %s2158_s21 = smov 8   ;;  %s2159_s20 = smov 16  }
  0xc2   : > { %1763 = vmatpush3.bf16.msra.mxu1 %v1762_v12  ;;  %s2160_s15 = smov 24   ;;  %s2652_s11 = sld [smem:[#allocation23_spill]] }
  0xc3   : > { %1757 = vmatpush3.bf16.msra.mxu0 %v1756_v13  ;;  %1701 = vmatprep.subr.mxu1 %v2148_v1  ;;  %s1645_s13 = sshll.u32 %s2130_s30, 7  ;;  %s2653_s24 = sld [smem:[#allocation24_spill]] }
  0xc4   : > { %1711 = vmatprep.subr.mxu0 %v2148_v1  ;;  %p2654_p2 = scmp.ne.s32.totalorder %s2644_s8, 0  ;;  %s2161_s30 = smov [#allocation12]  }
  0xc5   : > { %1699 = vmatmul.mubr.msk.f32.vlgmr.msra.gmra.mrb[0].mxu1 %vm481_vm0, %v484_v14 }
  0xc6   : > { %1688 = vmatmul.mubr.msk.f32.vlgmr.msra.gmra.mrb[0].mxu0 %vm481_vm0, %v483_v15  ;;  %1703 = vmatprep.mubr.msk.f32.mxu1 %vm2149_vm1, %v2148_v1 }
  0xc7   : > { %1713 = vmatprep.mubr.msk.f32.mxu0 %vm2149_vm1, %v2148_v1 }
 0x198   : > { %v2499_v17 = vpop.f32.mrb[0].mxu1 }
 0x199   : > { %989 = vrot.lane.b32.xlu1 %v2499_v17, %s2150_s7  ;;  %824 = vrot.lane.b32.xlu0 %v2499_v17, %s2151_s12  ;;  %v566_v18 = vpop.f32.mrb[0].mxu0  ;;  %v1700_v19 = vpop.f32.mrb[1].mxu1 }
 0x19a   : > { %v567_v20 = vadd.f32 %v1626_v16, %v566_v18  ;;  %1702 = vmatpush3.xpose.msk.msra.mxu1 %vm657_vm2, %v2499_v17  ;;  %v1689_v21 = vpop.f32.mrb[1].mxu0  ;;  %v1335_v19 = vld [vmem:[#allocation11] sm:$0xff] }
 0x19b   : > { %1706 = vmatprep.subr.mxu1 %v2148_v1 }
 0x19d   : > { %1704 = vmatmul.mubr.msk.f32.vlgmr.msra.gmra.mrb[2].mxu1 %vm657_vm2, %v567_v20  ;;  %987 = vrot.lane.b32.xlu1 %v567_v20, %s2150_s7  ;;  %s470_s7 = scalar_lea.vmem [#allocation12], %s2452_s4  ;;  %s2048_s4 = sshll.u32 %s2161_s30, 4  ;;  %s2049_s4 = int_to_ptr.vmem [resolvable:$false] %s2048_s4 }
 0x19e   : > { %822 = vrot.lane.b32.xlu0 %v567_v20, %s2151_s12  ;;  %1708 = vmatprep.mubr.msk.f32.mxu1 %vm2149_vm1, %v2148_v1  ;;  %s1442_s12 = sshll.u32 %s470_s7, 4  ;;  %s2564_s12 = int_to_ptr.vmem [resolvable:$true] %s1442_s12 }
 0x19f   : > { %p2051_p1 = scmp.lt.s32.totalorder %s2564_s12, %s2049_s4 }
 0x1a1   : > { %1152 = vrot.lane.b32.xlu1 %v567_v20, %s2152_s27  ;;  %v1336_v20 = vld [vmem:[#allocation11 + $0x8] sm:$0xff] }
 0x1a2   : > { %1154 = vrot.lane.b32.xlu0 %v2499_v17, %s2152_s27  ;;  %v1765_v21 = vpack.c.bf16 %v1336_v20, %v1335_v19 }
 0x20b   : > { %v825_v22 = vpop.permute.xlu0 %824  ;;  %v990_v23 = vpop.permute.xlu1 %989 }
 0x20c   : > { %1712 = vmatpush3.xpose.msk.msra.mxu0 %vm657_vm2, %v825_v22  ;;  %v1337_v22 = vld [vmem:[#allocation11 + $0x10] sm:$0xff] }
 0x20d   : > { %1721 = vmatprep.subr.mxu0 %v2148_v1 }
 0x20f   : > { %v988_v25 = vpop.permute.xlu1 %987 }
 0x210   : > { %v823_v24 = vpop.permute.xlu0 %822 }
 0x211   : > { %1714 = vmatmul.mubr.msk.f32.vlgmr.msra.gmra.mrb[2].mxu0 %vm657_vm2, %v823_v24 }
 0x212   : > { %1722 = vmatpush3.xpose.msk.msra.mxu0 %vm657_vm2, %v990_v23  ;;  %1723 = vmatprep.mubr.msk.f32.mxu0 %vm2149_vm1, %v2148_v1  ;;  %v1338_v23 = vld [vmem:[#allocation11 + $0x18] sm:$0xff] }
 0x213   : > { %1731 = vmatprep.subr.mxu0 %v2148_v1  ;;  %v1153_v27 = vpop.permute.xlu1 %1152  ;;  %v1768_v24 = vpack.c.bf16 %v1338_v23, %v1337_v22 }
 0x214   : > { %v1155_v26 = vpop.permute.xlu0 %1154 }
 0x215   : > { %1724 = vmatmul.mubr.msk.f32.vlgmr.msra.gmra.mrb[4].mxu0 %vm657_vm2, %v988_v25 }
 0x216   : > { %1732 = vmatpush3.xpose.msk.msra.mxu0 %vm657_vm2, %v1155_v26  ;;  %1733 = vmatprep.mubr.msk.f32.mxu0 %vm2149_vm1, %v2148_v1 }
 0x217   : > { %1764 = vmatprep.subr.bf16.mxu0 %v2147_v0 }
 0x219   : > { %1734 = vmatmul.mubr.msk.f32.vlgmr.msra.gmra.mrb[6].mxu0 %vm657_vm2, %v1153_v27 }
 0x21a   : > { %1749 = vmatprep.mubr.msk.f32.mxu0 %vm2149_vm1, %v2148_v1  ;;  %1766 = vmatpush3.bf16.msra.mxu0 %v1765_v21 }
 0x21b   : > { %1767 = vmatprep.subr.bf16.mxu0 %v2147_v0 }
 0x21e   : > { %1769 = vmatpush3.bf16.msra.mxu0 %v1768_v24 }
 0x270   : > { %v730_v28 = vpop.f32.mrb[2].mxu1 }
 0x271   : > { %v1705_v29 = vpop.f32.mrb[3].mxu1  ;;  %v734_v30 = vsel %vm657_vm2, %v730_v28, -inf }
 0x272   : > { %735 = vmax.xlane.f32.xlu0 %v734_v30 }
 0x2e4   : > { %v896_v31 = vpop.f32.mrb[2].mxu0 }
 0x2e5   : > { %v1715_v32 = vpop.f32.mrb[3].mxu0  ;;  %v900_v33 = vsel %vm657_vm2, %v896_v31, -inf }
 0x2e6   : > { %901 = vmax.xlane.f32.xlu1 %v900_v33 }
 0x2e8   : > { %v1061_v34 = vpop.f32.mrb[4].mxu0 }
 0x2e9   : > { %v1725_v35 = vpop.f32.mrb[5].mxu0  ;;  %v1065_v36 = vsel %vm657_vm2, %v1061_v34, -inf }
 0x2ea   : > { %1066 = vmax.xlane.f32.xlu0 %v1065_v36  ;;  %v1334_v35 = vld [vmem:[#allocation2] sm:$0xff] }
 0x2ec   : > { %v1226_v37 = vpop.f32.mrb[6].mxu0 }
 0x2ed   : > { %v1735_v38 = vpop.f32.mrb[7].mxu0  ;;  %v1230_v39 = vsel %vm657_vm2, %v1226_v37, -inf }
 0x2ee   : > { %1231 = vmax.xlane.f32.xlu0 %v1230_v39  ;;  %v1643_v39 = vld [vmem:[%s2652_s11] ss:$0 sm:$0xff] }
 0x2f7   : > { %653 = vrot.lane.b32.xlu1 %v1629_v40, %s2153_s6  ;;  %s2562_s6 = scalar_lea.hbm %s2653_s24, %s1645_s13 }
 0x2ff   : > { %v736_v41 = vpop.xlane.xlu0 %735 }
 0x300   : > { %v737_v42 = vsub.f32 %v730_v28, %v736_v41 }
 0x302   : > { %v738_v43 = vmul.f32 1.442695, %v737_v42 }
 0x304   : > { %1884 = vpow2.f32 %v738_v43 }
 0x30e   : > { %v1885_v44 = vpop.eup %1884 }
 0x30f   : > { %v740_v45 = vsel %vm657_vm2, %v1885_v44, 0.0 }
 0x310   : > { %741 = vadd.xlane.f32.xlu0 %v740_v45 }
 0x373   : > { %v902_v46 = vpop.xlane.xlu1 %901 }
 0x374   : > { %v903_v47 = vsub.f32 %v896_v31, %v902_v46 }
 0x376   : > { %v904_v48 = vmul.f32 1.442695, %v903_v47 }
 0x377   : > { %v654_v49 = vpop.permute.xlu1 %653  ;;  %v1067_v50 = vpop.xlane.xlu0 %1066 }
 0x378   : > { %1886 = vpow2.f32 %v904_v48  ;;  %v656_v51 = vadd.f32 %v654_v49, %v2499_v17  ;;  %v1068_v52 = vsub.f32 %v1061_v34, %v1067_v50 }
 0x37a   : > { %v1069_v53 = vmul.f32 1.442695, %v1068_v52  ;;  %746 = vrot.lane.b32.xlu1 %v656_v51, %s2154_s22  ;;  %s1428_s22 = scalar_lea.sflag [#allocation5], %s2449_s26 }
 0x37b   : > { %v1232_v54 = vpop.xlane.xlu0 %1231 }
 0x37c   : > { %1888 = vpow2.f32 %v1069_v53  ;;  %v1233_v55 = vsub.f32 %v1226_v37, %v1232_v54 }
 0x37e   : > { %v1234_v56 = vmul.f32 1.442695, %v1233_v55  ;;  %1076 = vrot.lane.b32.xlu1 %v656_v51, %s2155_s19  ;;  %s2044_s19 = scalar_lea.vmem %s2564_s12, 128 }
 0x37f   : > { %p2045_p0 = scmp.ne.s32.totalorder %s2564_s12, %s2044_s19 }
 0x380   : > { %1890 = vpow2.f32 %v1234_v56 }
 0x381   : > { %p2046_p4 = pnand %p2045_p0, %p2654_p2 }
 0x382   : > { %v1887_v57 = vpop.eup %1886  ;;  %1241 = vrot.lane.b32.xlu1 %v656_v51, %s2156_s23  ;;  %s2050_s23 = scalar_lea.vmem %s2049_s4, 256 }
 0x383   : > { %v906_v58 = vsel %vm657_vm2, %v1887_v57, 0.0  ;;  %p2047_p8 = pneg %p2046_p4  ;;  %p2052_p13 = scmp.lt.s32.totalorder %s2050_s23, %s2044_s19 }
 0x384   : > { %907 = vadd.xlane.f32.xlu0 %v906_v58 }
 0x385   : > { %p2053_p3 = por %p2052_p13, %p2051_p1 }
 0x386   : > { %v1889_v59 = vpop.eup %1888 }
 0x387   : > { %v1071_v60 = vsel %vm657_vm2, %v1889_v59, 0.0  ;;  %p2054_p5 = pnand %p2053_p3, %p2047_p8 }
 0x388   : > { %1072 = vadd.xlane.f32.xlu0 %v1071_v60 }
 0x38a   : > { %v1891_v61 = vpop.eup %1890 }
 0x38b   : > { %v1236_v62 = vsel %vm657_vm2, %v1891_v61, 0.0 }
 0x38c   : > { %1237 = vadd.xlane.f32.xlu0 %v1236_v62 }
 0x39d   : > { %v742_v63 = vpop.xlane.xlu0 %741 }
 0x39e   : > { %1892 = vrcp.f32 %v742_v63 }
 0x3a2   : > { %911 = vrot.lane.b32.xlu0 %v656_v51, %s2157_s14 }
 0x3a8   : > { %v1893_v2 = vpop.eup %1892 }
 0x3a9   : > { %v744_v3 = vmul.f32 %v1893_v2, %v1885_v44 }
 0x3ec   : > { %v747_v4 = vpop.permute.xlu1 %746 }
 0x3ed   : > { %1707 = vmatpush3.msra.mxu1 %v747_v4 }
 0x3ee   : > { %1709 = vmatmul.mubr.msk.f32.vlgmr.msra.gmra.mrb[4].mxu1 %vm657_vm2, %v744_v3  ;;  %1716 = vmatprep.subr.mxu1 %v2148_v1 }
 0x3ef   : > { %1718 = vmatprep.mubr.msk.f32.mxu1 %vm2149_vm1, %v2148_v1 }
 0x3f0   : > { %v1077_v9 = vpop.permute.xlu1 %1076 }
 0x3f4   : > { %v1242_v14 = vpop.permute.xlu1 %1241 }
 0x411   : > { %v908_v5 = vpop.xlane.xlu0 %907 }
 0x412   : > { %1894 = vrcp.f32 %v908_v5 }
 0x415   : > { %v1073_v6 = vpop.xlane.xlu0 %1072 }
 0x416   : > { %1896 = vrcp.f32 %v1073_v6 }
 0x419   : > { %v1238_v7 = vpop.xlane.xlu0 %1237 }
 0x41a   : > { %1898 = vrcp.f32 %v1238_v7 }
 0x41c   : > { %v1895_v8 = vpop.eup %1894 }
 0x41d   : > { %v910_v10 = vmul.f32 %v1895_v8, %v1887_v57  ;;  %v912_v11 = vpop.permute.xlu0 %911 }
 0x41e   : > { %1717 = vmatpush3.msra.mxu1 %v912_v11 }
 0x41f   : > { %1719 = vmatmul.mubr.msk.f32.vlgmr.msra.gmra.mrb[6].mxu1 %vm657_vm2, %v910_v10  ;;  %1726 = vmatprep.subr.mxu1 %v2148_v1 }
 0x420   : > { %v1897_v12 = vpop.eup %1896  ;;  %1727 = vmatpush3.msra.mxu1 %v1077_v9  ;;  %1728 = vmatprep.mubr.msk.f32.mxu1 %vm2149_vm1, %v2148_v1 }
 0x421   : > { %v1075_v13 = vmul.f32 %v1897_v12, %v1889_v59  ;;  %1736 = vmatprep.subr.mxu1 %v2148_v1 }
 0x423   : > { %1729 = vmatmul.mubr.msk.f32.vlgmr.msra.gmra.mrb[8].mxu1 %vm657_vm2, %v1075_v13 }
 0x424   : > { %v1899_v15 = vpop.eup %1898  ;;  %1737 = vmatpush3.msra.mxu1 %v1242_v14  ;;  %1738 = vmatprep.mubr.msk.f32.mxu1 %vm2149_vm1, %v2148_v1 }
 0x425   : > { %v1240_v16 = vmul.f32 %v1899_v15, %v1891_v61 }
 0x427   : > { %1739 = vmatmul.mubr.msk.f32.vlgmr.msra.gmra.mrb[10].mxu1 %vm657_vm2, %v1240_v16 }
 0x4c1   : > { %v818_v17 = vpop.f32.mrb[4].mxu1 }
 0x4c2   : > { %v1710_v18 = vpop.f32.mrb[5].mxu1 }
 0x4f2   : > { %v983_v25 = vpop.f32.mrb[6].mxu1 }
 0x4f3   : > { %1318 = vrot.lane.b32.xlu1 %v983_v25, %s2158_s21  ;;  %v1720_v26 = vpop.f32.mrb[7].mxu1 }
 0x4f6   : > { %v1148_v1 = vpop.f32.mrb[8].mxu1 }
 0x4f7   : > { %1322 = vrot.lane.b32.xlu1 %v1148_v1, %s2159_s20  ;;  %v1730_v27 = vpop.f32.mrb[9].mxu1 }
 0x4fa   : > { %v1313_v28 = vpop.f32.mrb[10].mxu1 }
 0x4fb   : > { %1326 = vrot.lane.b32.xlu1 %v1313_v28, %s2160_s15  ;;  %v1740_v29 = vpop.f32.mrb[11].mxu1 }
 0x565   : > { %v1319_v30 = vpop.permute.xlu1 %1318 }
 0x566   : > { %v1329_v31 = vsel %vm657_vm2, %v818_v17, %v1319_v30 }
 0x569   : > { %v1323_v0 = vpop.permute.xlu1 %1322 }
 0x56a   : > { %v1331_v32 = vsel %vm1330_vm3, %v1329_v31, %v1323_v0 }
 0x56d   : > { %v1327_v33 = vpop.permute.xlu1 %1326 }
 0x56e   : > { %v1333_v34 = vsel %vm1332_vm4, %v1331_v32, %v1327_v33 }
 0x56f   : > { %1750 = vmatmul.mubr.msk.f32.vlgmr.msra.gmra.mrb[8].mxu0 %vm481_vm0, %v1333_v34 }
 0x642   : > { %v1408_v36 = vpop.f32.mrb[8].mxu0 }
 0x643   : > { %v1412_v37 = vadd.f32 %v1408_v36, %v1334_v35  ;;  %v1751_v38 = vpop.f32.mrb[9].mxu0 }
 0x645   : > { %1413 = vst.msk [vmem:[#allocation2] sm:$0xff] %vm481_vm0, %v1412_v37 }
 0x64c   : > { %v1417_v40 = vld [vmem:[#allocation2] sm:$0xff] }
 0x64d   : > { %v1425_v41 = vadd.f32 %v1643_v39, %v1417_v40 }
 0x64f   : > { %1426 = vst.msk [vmem:[%s470_s7] sm:$0xff] %vm481_vm0, %v1425_v41 }
 0x650   : > { %2057 = shalt.err (!%p2054_p5)
}
 0x651   : > { %s2058_s26 = scalar_lea.hbm %s2562_s6, 128  ;;  %s2062_s20 = scalar_lea.hbm %s2653_s24, 256 }
 0x652   : > { %p2059_p6 = scmp.ne.s32.totalorder %s2562_s6, %s2058_s26  ;;  %p2063_p12 = scmp.lt.u32.totalorder %s2562_s6, %s2653_s24 }
 0x653   : > { %p2064_p11 = scmp.lt.u32.totalorder %s2062_s20, %s2058_s26  ;;  %p2066_p0 = scmp.lt.u32.totalorder %s2058_s26, %s2562_s6 }
 0x654   : > { %p2060_p10 = pnand %p2059_p6, %p2654_p2 }
 0x655   : > { %p2065_p9 = por %p2064_p11, %p2063_p12 }
 0x656   : > { %p2061_p7 = pneg %p2060_p10 }
 0x657   : > { %p2067_p4 = por %p2066_p0, %p2065_p9 }
 0x659   : > { %p2068_p8 = pnand %p2067_p4, %p2061_p7 }
 0x65b   : > { %2071 = shalt.err (!%p2068_p8)
}
 0x65c   : > { %1786 = dma.vmem_to_hbm [thread:$0]  (%p2654_p2), %s2564_s12, 128, %s2562_s6, %s1428_s22  }
 0x65d PF: > { %s2655_s16 = sld [smem:[#allocation18_spill]]  ;;  %s2656_s11 = sld [smem:[#allocation19_spill]] }
 0x65e   : > { %p2658_p13 = scmp.ge.s32.totalorder %s2138_s10, 2 }
 0x663   : > { %s1454_s13 = sand.u32 1, %s2655_s16   ;;  %p2657_p1 = scmp.ne.s32.totalorder %s2656_s11, 0 }
 0x664   : > { %s1455_s7 = scalar_lea.sflag [#allocation5], %s1454_s13 }
 0x665   : > { %p1806_p3 = pnand %p2658_p13, %p2657_p1 }
 0x667   : > { %2113 = dma.done.wait (!%p1806_p3), %s1455_s7, 128  }
 0x668   : > { %2115 = vsyncadd (!%p1806_p3), %s1455_s7, 4294967168  ;;  %s28_s10 = sadd.s32 1, %s2138_s10   ;;  %s2659_s27 = smov %s2122_s28 }
 0x669   : > { %p25_p5 = scmp.ge.s32.totalorder %s28_s10, 4   ;;  %s2660_s28 = smov %s2126_s29 }
 0x66a   : > { %s2661_s29 = smov %s2377_s25  ;;  %s2662_s30 = smov %s2134_s9 }
 0x66b   : > { %s2663_s9 = smov %s2665_s18  ;;  %27 = sbr.rel (!%p25_p5) target bundleno = 15 (0xf), region = 139 }
 0x672   :  { %1460 = vsyncpa [#allocation4], 1 }
 0x673   :  { %1462 = vsyncpa [#allocation4 + $0x1], 1 }
 0x674   :  { %1463 = vsyncpa [#allocation7], 1 }
 0x675   :  { %1465 = vsyncpa [#allocation7 + $0x1], 1 }
 0x676   :  { %1466 = vsyncpa [#allocation10], 1 }
 0x677   :  { %1467 = vsyncpa [#allocation5], 1 }
 0x678   :  { %1469 = vsyncpa [#allocation5 + $0x1], 1 }

</bundles_post_ra>
